<compile_context>
chip_gen: v6e
topology: v6e:2x2x1
jax: 0.10.0
libtpu: 0.0.40
codegen_flags: <defaults>
</compile_context>

<pallas_src>
import numpy as np
import jax
import jax.numpy as jnp
from jax.experimental import pallas as pl
from jax.experimental.pallas import tpu as pltpu


def build_grid(resolution):
    """JAX/numpy mirror of the PyTorch build_grid: returns [1, H, W, 4] float32."""
    ranges = [np.linspace(0.0, 1.0, num=res) for res in resolution]
    grid = np.meshgrid(*ranges, sparse=False, indexing="ij")
    grid = np.stack(grid, axis=-1)
    grid = np.reshape(grid, [resolution[0], resolution[1], -1])
    grid = np.expand_dims(grid, axis=0).astype(np.float32)
    grid = np.concatenate([grid, 1.0 - grid], axis=-1)  # [1, H, W, 4]
    return jnp.asarray(grid)


# ---------------------------------------------------------------------------
# Stage 1: one-shot positional projection (batch-invariant), computed once.
# ---------------------------------------------------------------------------
def _pos_proj_kernel(g_ref, w_ref, b_ref, o_ref):
    # g: (HW, 4) f32, w: (4, C) f32, b: (1, C) f32, o: (HW, C) f32
    g = g_ref[...]
    w = w_ref[...]
    b = b_ref[...]
    # Unrolled K=4 VPU FMAs instead of an MXU matmul (<4% MXU contraction util).
    acc = g[:, 0:1] * w[0:1, :]
    acc = acc + g[:, 1:2] * w[1:2, :]
    acc = acc + g[:, 2:3] * w[2:3, :]
    acc = acc + g[:, 3:4] * w[3:4, :]
    o_ref[...] = acc + b


def _positional_projection(grid_flat, w_t, b2d):
    HW = grid_flat.shape[0]
    C = w_t.shape[1]
    # Tiny one-shot kernel; whole arrays live in VMEM (no grid / no tiling).
    return pl.pallas_call(
        _pos_proj_kernel,
        out_shape=jax.ShapeDtypeStruct((HW, C), jnp.float32),
    )(grid_flat, w_t, b2d)


# ---------------------------------------------------------------------------
# Stage 2: lane-dense broadcast add (the memory-bound hot path).
# ---------------------------------------------------------------------------
def _bcast_add_kernel(x_ref, pos_ref, o_ref):
    # x: (B, tn), pos: (1, tn), tn is a large multiple of 128 (lane-dense).
    # Add in f32, cast once at the end (matters only for sub-f32 inputs).
    o_ref[...] = (x_ref[...].astype(jnp.float32) + pos_ref[...]).astype(o_ref.dtype)


def _pick_tile_n(N, B, itemsize, max_block_bytes=2 << 20):
    """Largest multiple-of-128 divisor of N with B*tn*itemsize <= budget."""
    if N % 128 != 0:
        return N  # must take the full axis (still equals the full array dim)
    tn = 128
    cand = 128
    while cand <= N:
        if N % cand == 0 and B * cand * itemsize <= max_block_bytes:
            tn = cand
        cand += 128
    return tn


def soft_position_embed(inputs, grid, weight, bias):
    """inputs: [B, H, W, C]; grid: [1, H, W, 4]; weight: [C, 4] (PyTorch layout); bias: [C]."""
    B, H, W, C = inputs.shape
    HW = H * W
    N = HW * C

    grid_flat = grid.reshape(HW, 4).astype(jnp.float32)
    w_t = weight.astype(jnp.float32).T          # (4, C)
    b2d = bias.astype(jnp.float32).reshape(1, C)

    # Batch-invariant projection, computed exactly once.
    pos = _positional_projection(grid_flat, w_t, b2d)        # (HW, C) f32
    pos_flat = pos.reshape(1, N)                              # lane-dense row

    # Flatten features so the last (lane) dim is a big multiple of 128.
    x_flat = inputs.reshape(B, N)

    itemsize = jnp.dtype(inputs.dtype).itemsize
    tn = _pick_tile_n(N, B, itemsize)
    grid_steps = N // tn

    out_flat = pl.pallas_call(
        _bcast_add_kernel,
        out_shape=jax.ShapeDtypeStruct((B, N), inputs.dtype),
        grid_spec=pltpu.PrefetchScalarGridSpec(
            num_scalar_prefetch=0,
            grid=(grid_steps,),
            in_specs=[
                pl.BlockSpec((B, tn), lambda j: (0, j)),
                pl.BlockSpec((1, tn), lambda j: (0, j)),
            ],
            out_specs=pl.BlockSpec((B, tn), lambda j: (0, j)),
        ),
        compiler_params=pltpu.CompilerParams(
            dimension_semantics=("parallel",),
        ),
    )(x_flat, pos_flat)

    return out_flat.reshape(B, H, W, C)


if __name__ == "__main__":
    # Shapes consistent with the module: hidden_size=32, resolution=(16,16), batch=2.
    B, H, W, C = 2, 16, 16, 32
    resolution = (H, W)

    key = jax.random.PRNGKey(0)
    k_x, k_w, k_b = jax.random.split(key, 3)

    inputs = jax.random.normal(k_x, (B, H, W, C), dtype=jnp.float32)
    # nn.Linear(4, hidden_size) parameter shapes: weight [C, 4], bias [C].
    weight = jax.random.normal(k_w, (C, 4), dtype=jnp.float32) * 0.5
    bias = jax.random.normal(k_b, (C,), dtype=jnp.float32) * 0.1

    grid = build_grid(resolution)  # [1, H, W, 4]

    out = soft_position_embed(inputs, grid, weight, bias)
    out = jax.block_until_ready(out)

    # Pure-JAX reference of the forward semantics: inputs + grid @ W^T + b
    ref = inputs + (jnp.einsum("ohwk,ck->ohwc", grid, weight) + bias)
    np.testing.assert_allclose(np.asarray(out), np.asarray(ref), rtol=1e-5, atol=1e-5)

    print("KERNEL_OK")
</pallas_src>

<mosaic_0001>
module attributes {stable_mosaic.version = 11 : i64} {
  func.func @_pos_proj_kernel(%arg0: memref<256x4xf32, #tpu.memory_space<vmem>>, %arg1: memref<4x32xf32, #tpu.memory_space<vmem>>, %arg2: memref<1x32xf32, #tpu.memory_space<vmem>>, %arg3: memref<256x32xf32, #tpu.memory_space<vmem>>) attributes {dimension_semantics = [], scalar_prefetch = 0 : i64, scratch_operands = 0 : i64, tpu.core_type = #tpu.core_type<tc>} {
    %c0 = arith.constant 0 : index
    %c0_0 = arith.constant 0 : index
    %0 = vector.load %arg0[%c0, %c0_0] : memref<256x4xf32, #tpu.memory_space<vmem>>, vector<256x4xf32>
    %c0_1 = arith.constant 0 : index
    %c0_2 = arith.constant 0 : index
    %1 = vector.load %arg1[%c0_1, %c0_2] : memref<4x32xf32, #tpu.memory_space<vmem>>, vector<4x32xf32>
    %c0_3 = arith.constant 0 : index
    %c0_4 = arith.constant 0 : index
    %2 = vector.load %arg2[%c0_3, %c0_4] : memref<1x32xf32, #tpu.memory_space<vmem>>, vector<1x32xf32>
    %3 = vector.extract_strided_slice %0 {offsets = [0, 0], sizes = [256, 1], strides = [1, 1]} : vector<256x4xf32> to vector<256x1xf32>
    %4 = vector.extract_strided_slice %1 {offsets = [0, 0], sizes = [1, 32], strides = [1, 1]} : vector<4x32xf32> to vector<1x32xf32>
    %5 = vector.broadcast %3 : vector<256x1xf32> to vector<256x32xf32>
    %6 = vector.broadcast %4 : vector<1x32xf32> to vector<256x32xf32>
    %7 = arith.mulf %5, %6 : vector<256x32xf32>
    %8 = vector.extract_strided_slice %0 {offsets = [0, 1], sizes = [256, 1], strides = [1, 1]} : vector<256x4xf32> to vector<256x1xf32>
    %9 = vector.extract_strided_slice %1 {offsets = [1, 0], sizes = [1, 32], strides = [1, 1]} : vector<4x32xf32> to vector<1x32xf32>
    %10 = vector.broadcast %8 : vector<256x1xf32> to vector<256x32xf32>
    %11 = vector.broadcast %9 : vector<1x32xf32> to vector<256x32xf32>
    %12 = arith.mulf %10, %11 : vector<256x32xf32>
    %13 = arith.addf %7, %12 : vector<256x32xf32>
    %14 = vector.extract_strided_slice %0 {offsets = [0, 2], sizes = [256, 1], strides = [1, 1]} : vector<256x4xf32> to vector<256x1xf32>
    %15 = vector.extract_strided_slice %1 {offsets = [2, 0], sizes = [1, 32], strides = [1, 1]} : vector<4x32xf32> to vector<1x32xf32>
    %16 = vector.broadcast %14 : vector<256x1xf32> to vector<256x32xf32>
    %17 = vector.broadcast %15 : vector<1x32xf32> to vector<256x32xf32>
    %18 = arith.mulf %16, %17 : vector<256x32xf32>
    %19 = arith.addf %13, %18 : vector<256x32xf32>
    %20 = vector.extract_strided_slice %0 {offsets = [0, 3], sizes = [256, 1], strides = [1, 1]} : vector<256x4xf32> to vector<256x1xf32>
    %21 = vector.extract_strided_slice %1 {offsets = [3, 0], sizes = [1, 32], strides = [1, 1]} : vector<4x32xf32> to vector<1x32xf32>
    %22 = vector.broadcast %20 : vector<256x1xf32> to vector<256x32xf32>
    %23 = vector.broadcast %21 : vector<1x32xf32> to vector<256x32xf32>
    %24 = arith.mulf %22, %23 : vector<256x32xf32>
    %25 = arith.addf %19, %24 : vector<256x32xf32>
    %26 = vector.broadcast %2 : vector<1x32xf32> to vector<256x32xf32>
    %27 = arith.addf %25, %26 : vector<256x32xf32>
    %c0_5 = arith.constant 0 : index
    %c0_6 = arith.constant 0 : index
    %28 = vector.load %arg3[%c0_5, %c0_6] : memref<256x32xf32, #tpu.memory_space<vmem>>, vector<256x32xf32>
    tpu.vector_store %arg3[%c0_5, %c0_6], %27 {strides = array<i32>} : memref<256x32xf32, #tpu.memory_space<vmem>>, vector<256x32xf32>,
    return
  }
}

</mosaic_0001>

<bundles_post_ra>
// kernel: tpu_custom_call.1
= control target key start
LH: loop header
LB: loop body
LE: loop exit
PB: predicated region body
PF: predicated region fallthrough
CT: control target
= control target key end

     0   :  { %v920_v0 = vmov 0   ;;  %v921_v33 = vmov 1   ;;  %v922_v38 = vmov 2   ;;  %v208_v57 = vlaneseq  ;;  %s1836_s0 = inlined_call_operand.vmem [shape: f32[256,4], index: 0, kind: input, shape index: {}]   ;;  %s1837_s1 = inlined_call_operand.vmem [shape: f32[4,32], index: 1, kind: input, shape index: {}]   ;;  %s1838_s2 = inlined_call_operand.vmem [shape: f32[1,32], index: 2, kind: input, shape index: {}]   ;;  %s1839_s3 = inlined_call_operand.vmem [shape: f32[256,32], index: 3, kind: output, shape index: {}]  }
   0x1   :  { %913 = vset.pattern.permute.xlu1 %v920_v0  ;;  %912 = vset.pattern.permute.xlu0 %v920_v0  ;;  %v947_v1 = vld [vmem:[%s1836_s0 + $0x10] sm:$0xff]  ;;  %v952_v2 = vld [vmem:[%s1836_s0] sm:$0xff]  ;;  %v959_v3 = vld [vmem:[%s1836_s0 + $0x18] sm:$0xff]  ;;  %vm870_vm0 = vcmask 261120  }
   0x2   :  { %60 = vperm.xlu1 %913, %v947_v1   ;;  %50 = vperm.xlu0 %912, %v952_v2   ;;  %v964_v4 = vld [vmem:[%s1836_s0 + $0x8] sm:$0xff]  ;;  %v976_v6 = vld [vmem:[%s1836_s0 + $0x20] sm:$0xff]  ;;  %v983_v7 = vld [vmem:[%s1836_s0 + $0x38] sm:$0xff]  ;;  %v1236_v60 = vshrl.u32 %v208_v57, 7 }
   0x3   :  { %v971_v5 = vld [vmem:[%s1836_s0 + $0x28] sm:$0xff]  ;;  %v988_v8 = vld [vmem:[%s1836_s0 + $0x30] sm:$0xff]  ;;  %v1000_v10 = vld [vmem:[%s1836_s0 + $0x40] sm:$0xff] }
   0x4   :  { %v995_v9 = vld [vmem:[%s1836_s0 + $0x48] sm:$0xff]  ;;  %v1007_v11 = vld [vmem:[%s1836_s0 + $0x58] sm:$0xff]  ;;  %v1012_v12 = vld [vmem:[%s1836_s0 + $0x50] sm:$0xff]  ;;  %v210_v63 = vsub.s32 0, %v1236_v60 }
   0x5   :  { %v1019_v13 = vld [vmem:[%s1836_s0 + $0x68] sm:$0xff]  ;;  %v1024_v14 = vld [vmem:[%s1836_s0 + $0x60] sm:$0xff]  ;;  %v1031_v15 = vld [vmem:[%s1836_s0 + $0x78] sm:$0xff] }
   0x6   :  { %65 = vperm.xlu1 %913, %v959_v3   ;;  %55 = vperm.xlu0 %912, %v964_v4   ;;  %v1036_v16 = vld [vmem:[%s1836_s0 + $0x70] sm:$0xff]  ;;  %v1043_v17 = vld [vmem:[%s1836_s0 + $0x88] sm:$0xff]  ;;  %v1048_v18 = vld [vmem:[%s1836_s0 + $0x80] sm:$0xff] }
   0x7   :  { %v1055_v19 = vld [vmem:[%s1836_s0 + $0x98] sm:$0xff]  ;;  %v1060_v20 = vld [vmem:[%s1836_s0 + $0x90] sm:$0xff]  ;;  %v1067_v21 = vld [vmem:[%s1836_s0 + $0xa8] sm:$0xff] }
   0x8   :  { %v1072_v22 = vld [vmem:[%s1836_s0 + $0xa0] sm:$0xff]  ;;  %v1079_v23 = vld [vmem:[%s1836_s0 + $0xb8] sm:$0xff]  ;;  %v1084_v24 = vld [vmem:[%s1836_s0 + $0xb0] sm:$0xff] }
   0x9   :  { %v1091_v25 = vld [vmem:[%s1836_s0 + $0xc8] sm:$0xff]  ;;  %v1096_v26 = vld [vmem:[%s1836_s0 + $0xc0] sm:$0xff]  ;;  %v1103_v27 = vld [vmem:[%s1836_s0 + $0xd8] sm:$0xff] }
   0xa   :  { %75 = vperm.xlu1 %913, %v971_v5   ;;  %70 = vperm.xlu0 %912, %v976_v6   ;;  %v1108_v28 = vld [vmem:[%s1836_s0 + $0xd0] sm:$0xff]  ;;  %v1115_v29 = vld [vmem:[%s1836_s0 + $0xe8] sm:$0xff]  ;;  %v1120_v30 = vld [vmem:[%s1836_s0 + $0xe0] sm:$0xff] }
   0xb   :  { %v1127_v31 = vld [vmem:[%s1836_s0 + $0xf8] sm:$0xff]  ;;  %v1132_v32 = vld [vmem:[%s1836_s0 + $0xf0] sm:$0xff]  ;;  %v1250_v0 = vld [vmem:[%s1837_s1] sm:$0xf] }
   0xc   :  { %v1257_v57 = vrot.slane %v1250_v0, %v210_v63 }
   0xe   :  { %85 = vperm.xlu1 %913, %v983_v7   ;;  %80 = vperm.xlu0 %912, %v988_v8  }
  0x12   :  { %95 = vperm.xlu1 %913, %v995_v9   ;;  %90 = vperm.xlu0 %912, %v1000_v10  }
  0x16   :  { %105 = vperm.xlu1 %913, %v1007_v11   ;;  %100 = vperm.xlu0 %912, %v1012_v12  }
  0x1a   :  { %115 = vperm.xlu1 %913, %v1019_v13   ;;  %110 = vperm.xlu0 %912, %v1024_v14  }
  0x1e   :  { %125 = vperm.xlu1 %913, %v1031_v15   ;;  %120 = vperm.xlu0 %912, %v1036_v16  }
  0x22   :  { %135 = vperm.xlu1 %913, %v1043_v17   ;;  %130 = vperm.xlu0 %912, %v1048_v18  }
  0x26   :  { %145 = vperm.xlu1 %913, %v1055_v19   ;;  %140 = vperm.xlu0 %912, %v1060_v20  }
  0x2a   :  { %155 = vperm.xlu1 %913, %v1067_v21   ;;  %150 = vperm.xlu0 %912, %v1072_v22  }
  0x2e   :  { %165 = vperm.xlu1 %913, %v1079_v23   ;;  %160 = vperm.xlu0 %912, %v1084_v24  }
  0x32   :  { %175 = vperm.xlu1 %913, %v1091_v25   ;;  %170 = vperm.xlu0 %912, %v1096_v26  }
  0x36   :  { %185 = vperm.xlu1 %913, %v1103_v27   ;;  %180 = vperm.xlu0 %912, %v1108_v28  }
  0x3a   :  { %195 = vperm.xlu1 %913, %v1115_v29   ;;  %190 = vperm.xlu0 %912, %v1120_v30  }
  0x3e   :  { %205 = vperm.xlu1 %913, %v1127_v31   ;;  %200 = vperm.xlu0 %912, %v1132_v32  }
  0x42   :  { %915 = vset.pattern.permute.xlu1 %v921_v33  ;;  %914 = vset.pattern.permute.xlu0 %v921_v33 }
  0x43   :  { %249 = vperm.xlu1 %915, %v964_v4   ;;  %245 = vperm.xlu0 %914, %v952_v2  }
  0x47   :  { %253 = vperm.xlu1 %915, %v947_v1   ;;  %257 = vperm.xlu0 %914, %v959_v3  }
  0x4b   :  { %261 = vperm.xlu1 %915, %v976_v6   ;;  %265 = vperm.xlu0 %914, %v971_v5  }
  0x4f   :  { %269 = vperm.xlu1 %915, %v988_v8   ;;  %273 = vperm.xlu0 %914, %v983_v7  }
  0x53   :  { %277 = vperm.xlu1 %915, %v1000_v10   ;;  %281 = vperm.xlu0 %914, %v995_v9  }
  0x57   :  { %285 = vperm.xlu1 %915, %v1012_v12   ;;  %289 = vperm.xlu0 %914, %v1007_v11  }
  0x5b   :  { %293 = vperm.xlu1 %915, %v1024_v14   ;;  %297 = vperm.xlu0 %914, %v1019_v13  }
  0x5f   :  { %301 = vperm.xlu1 %915, %v1036_v16   ;;  %305 = vperm.xlu0 %914, %v1031_v15  }
  0x63   :  { %309 = vperm.xlu1 %915, %v1048_v18   ;;  %313 = vperm.xlu0 %914, %v1043_v17  }
  0x67   :  { %317 = vperm.xlu1 %915, %v1060_v20   ;;  %321 = vperm.xlu0 %914, %v1055_v19  }
  0x6b   :  { %325 = vperm.xlu1 %915, %v1072_v22   ;;  %329 = vperm.xlu0 %914, %v1067_v21  }
  0x6f   :  { %333 = vperm.xlu1 %915, %v1084_v24   ;;  %337 = vperm.xlu0 %914, %v1079_v23  }
  0x73   :  { %341 = vperm.xlu1 %915, %v1096_v26   ;;  %345 = vperm.xlu0 %914, %v1091_v25  }
  0x77   :  { %349 = vperm.xlu1 %915, %v1108_v28   ;;  %353 = vperm.xlu0 %914, %v1103_v27  }
  0x7b   :  { %357 = vperm.xlu1 %915, %v1120_v30   ;;  %361 = vperm.xlu0 %914, %v1115_v29  }
  0x7d   :  { %v1166_v34 = vpop.permute.xlu1 %60  ;;  %v1168_v35 = vpop.permute.xlu0 %50 }
  0x7f   :  { %365 = vperm.xlu1 %915, %v1132_v32   ;;  %369 = vperm.xlu0 %914, %v1127_v31  }
  0x81   :  { %v1172_v36 = vpop.permute.xlu1 %65  ;;  %v1174_v37 = vpop.permute.xlu0 %55 }
  0x83   :  { %916 = vset.pattern.permute.xlu1 %v922_v38  ;;  %917 = vset.pattern.permute.xlu0 %v922_v38 }
  0x84   :  { %441 = vperm.xlu1 %916, %v952_v2   ;;  %445 = vperm.xlu0 %917, %v964_v4  }
  0x85   :  { %v1178_v39 = vpop.permute.xlu1 %75  ;;  %v1180_v40 = vpop.permute.xlu0 %70 }
  0x88   :  { %449 = vperm.xlu1 %916, %v947_v1   ;;  %457 = vperm.xlu0 %917, %v976_v6  }
  0x89   :  { %v1184_v41 = vpop.permute.xlu1 %85  ;;  %v1186_v42 = vpop.permute.xlu0 %80 }
  0x8c   :  { %453 = vperm.xlu1 %916, %v959_v3   ;;  %465 = vperm.xlu0 %917, %v988_v8  }
  0x8d   :  { %v1190_v43 = vpop.permute.xlu1 %95  ;;  %v1192_v44 = vpop.permute.xlu0 %90 }
  0x8e   :  { %1840 = vst [vmem:[#allocation2_spill] sm:$0xff] %v1190_v43 }
  0x90   :  { %461 = vperm.xlu1 %916, %v971_v5   ;;  %473 = vperm.xlu0 %917, %v1000_v10  }
  0x91   :  { %v1196_v45 = vpop.permute.xlu1 %105  ;;  %v1198_v46 = vpop.permute.xlu0 %100 }
  0x92   :  { %1841 = vst [vmem:[#allocation3_spill] sm:$0xff] %v1196_v45 }
  0x94   :  { %469 = vperm.xlu1 %916, %v983_v7   ;;  %481 = vperm.xlu0 %917, %v1012_v12  }
  0x95   :  { %v1202_v47 = vpop.permute.xlu1 %115  ;;  %v1204_v48 = vpop.permute.xlu0 %110 }
  0x96   :  { %1842 = vst [vmem:[#allocation4_spill] sm:$0xff] %v1202_v47 }
  0x98   :  { %477 = vperm.xlu1 %916, %v995_v9   ;;  %489 = vperm.xlu0 %917, %v1024_v14  }
  0x99   :  { %v1208_v49 = vpop.permute.xlu1 %125  ;;  %v1210_v50 = vpop.permute.xlu0 %120 }
  0x9a   :  { %1843 = vst [vmem:[#allocation5_spill] sm:$0xff] %v1208_v49 }
  0x9c   :  { %485 = vperm.xlu1 %916, %v1007_v11   ;;  %497 = vperm.xlu0 %917, %v1036_v16  }
  0x9d   :  { %v1214_v51 = vpop.permute.xlu1 %135  ;;  %v1216_v52 = vpop.permute.xlu0 %130 }
  0x9e   :  { %1844 = vst [vmem:[#allocation6_spill] sm:$0xff] %v1214_v51 }
  0xa0   :  { %493 = vperm.xlu1 %916, %v1019_v13   ;;  %505 = vperm.xlu0 %917, %v1048_v18  }
  0xa1   :  { %v1220_v53 = vpop.permute.xlu1 %145  ;;  %v1222_v54 = vpop.permute.xlu0 %140 }
  0xa2   :  { %1845 = vst [vmem:[#allocation7_spill] sm:$0xff] %v1220_v53 }
  0xa4   :  { %501 = vperm.xlu1 %916, %v1031_v15   ;;  %513 = vperm.xlu0 %917, %v1060_v20  }
  0xa5   :  { %v1226_v55 = vpop.permute.xlu1 %155  ;;  %v1228_v56 = vpop.permute.xlu0 %150 }
  0xa6   :  { %1846 = vst [vmem:[#allocation8_spill] sm:$0xff] %v1226_v55 }
  0xa8   :  { %509 = vperm.xlu1 %916, %v1043_v17   ;;  %521 = vperm.xlu0 %917, %v1072_v22  }
  0xa9   :  { %v1232_v58 = vpop.permute.xlu1 %165  ;;  %v1234_v59 = vpop.permute.xlu0 %160 }
  0xaa   :  { %1847 = vst [vmem:[#allocation9_spill] sm:$0xff] %v1232_v58 }
  0xac   :  { %517 = vperm.xlu1 %916, %v1055_v19   ;;  %529 = vperm.xlu0 %917, %v1084_v24  }
  0xad   :  { %v1240_v61 = vpop.permute.xlu1 %175  ;;  %v1242_v62 = vpop.permute.xlu0 %170 }
  0xae   :  { %1848 = vst [vmem:[#allocation10_spill] sm:$0xff] %v1240_v61 }
  0xb0   :  { %525 = vperm.xlu1 %916, %v1067_v21   ;;  %537 = vperm.xlu0 %917, %v1096_v26  }
  0xb1   :  { %v1252_v33 = vpop.permute.xlu1 %185  ;;  %v1254_v38 = vpop.permute.xlu0 %180 }
  0xb2   :  { %1849 = vst [vmem:[#allocation11_spill] sm:$0xff] %v1252_v33 }
  0xb4   :  { %533 = vperm.xlu1 %916, %v1079_v23   ;;  %545 = vperm.xlu0 %917, %v1108_v28  }
  0xb5   :  { %v1261_v61 = vpop.permute.xlu1 %195  ;;  %v191_v58 = vpop.permute.xlu0 %190 }
  0xb6   :  { %1850 = vst [vmem:[#allocation12_spill] sm:$0xff] %v1261_v61  ;;  %v1264_v55 = vmul.f32 %v1257_v57, %v191_v58  ;;  %v923_v58 = vmov 3  }
  0xb8   :  { %541 = vperm.xlu1 %916, %v1091_v25   ;;  %553 = vperm.xlu0 %917, %v1120_v30  }
  0xb9   :  { %v1268_v33 = vpop.permute.xlu1 %205  ;;  %v201_v53 = vpop.permute.xlu0 %200 }
  0xba   :  { %1851 = vst [vmem:[#allocation13_spill] sm:$0xff] %v1268_v33  ;;  %v1271_v63 = vmul.f32 %v1257_v57, %v201_v53 }
  0xbc   :  { %549 = vperm.xlu1 %916, %v1103_v27   ;;  %561 = vperm.xlu0 %917, %v1132_v32  }
  0xbe   :  { %v1275_v51 = vpop.permute.xlu1 %249  ;;  %v1277_v61 = vpop.permute.xlu0 %245 }
  0xc0   :  { %557 = vperm.xlu1 %916, %v1115_v29   ;;  %918 = vset.pattern.permute.xlu0 %v923_v58 }
  0xc1   :  { %637 = vperm.xlu0 %918, %v952_v2  }
  0xc2   :  { %v1281_v49 = vpop.permute.xlu1 %253  ;;  %v1283_v33 = vpop.permute.xlu0 %257 }
  0xc4   :  { %565 = vperm.xlu1 %916, %v1127_v31  }
  0xc5   :  { %649 = vperm.xlu0 %918, %v959_v3  }
  0xc6   :  { %v1287_v53 = vpop.permute.xlu1 %261  ;;  %v1289_v47 = vpop.permute.xlu0 %265 }
  0xc8   :  { %919 = vset.pattern.permute.xlu1 %v923_v58 }
  0xc9   :  { %641 = vperm.xlu1 %919, %v964_v4   ;;  %657 = vperm.xlu0 %918, %v971_v5  }
  0xca   :  { %v1293_v45 = vpop.permute.xlu1 %269  ;;  %v1295_v2 = vpop.permute.xlu0 %273 }
  0xcd   :  { %645 = vperm.xlu1 %919, %v947_v1   ;;  %665 = vperm.xlu0 %918, %v983_v7  }
  0xce   :  { %v1299_v43 = vpop.permute.xlu1 %277  ;;  %v1301_v3 = vpop.permute.xlu0 %281 }
  0xd1   :  { %653 = vperm.xlu1 %919, %v976_v6   ;;  %673 = vperm.xlu0 %918, %v995_v9  }
  0xd2   :  { %v1305_v58 = vpop.permute.xlu1 %285  ;;  %v1307_v4 = vpop.permute.xlu0 %289 }
  0xd5   :  { %661 = vperm.xlu1 %919, %v988_v8   ;;  %681 = vperm.xlu0 %918, %v1007_v11  }
  0xd6   :  { %v1311_v5 = vpop.permute.xlu1 %293  ;;  %v1313_v1 = vpop.permute.xlu0 %297 }
  0xd9   :  { %669 = vperm.xlu1 %919, %v1000_v10   ;;  %689 = vperm.xlu0 %918, %v1019_v13  }
  0xda   :  { %v1317_v7 = vpop.permute.xlu1 %301  ;;  %v1319_v6 = vpop.permute.xlu0 %305 }
  0xdd   :  { %677 = vperm.xlu1 %919, %v1012_v12   ;;  %697 = vperm.xlu0 %918, %v1031_v15  }
  0xde   :  { %v1323_v9 = vpop.permute.xlu1 %309  ;;  %v1325_v8 = vpop.permute.xlu0 %313 }
  0xe1   :  { %685 = vperm.xlu1 %919, %v1024_v14   ;;  %705 = vperm.xlu0 %918, %v1043_v17  }
  0xe2   :  { %v1329_v11 = vpop.permute.xlu1 %317  ;;  %v1331_v10 = vpop.permute.xlu0 %321 }
  0xe5   :  { %693 = vperm.xlu1 %919, %v1036_v16   ;;  %713 = vperm.xlu0 %918, %v1055_v19   ;;  %v374_v19 = vsub.s32 1, %v1236_v60 }
  0xe6   :  { %v1335_v13 = vpop.permute.xlu1 %325  ;;  %v1337_v12 = vpop.permute.xlu0 %329 }
  0xe9   :  { %701 = vperm.xlu1 %919, %v1048_v18   ;;  %721 = vperm.xlu0 %918, %v1067_v21  }
  0xea   :  { %v1341_v15 = vpop.permute.xlu1 %333  ;;  %v1343_v14 = vpop.permute.xlu0 %337 }
  0xeb   :  { %1852 = vst [vmem:[#allocation14_spill] sm:$0xff] %v1343_v14  ;;  %v1359_v14 = vrot.slane %v1250_v0, %v374_v19 }
  0xed   :  { %709 = vperm.xlu1 %919, %v1060_v20   ;;  %729 = vperm.xlu0 %918, %v1079_v23  }
  0xee   :  { %v1347_v17 = vpop.permute.xlu1 %341  ;;  %v1349_v16 = vpop.permute.xlu0 %345 }
  0xef   :  { %1853 = vst [vmem:[#allocation15_spill] sm:$0xff] %v1349_v16 }
  0xf1   :  { %717 = vperm.xlu1 %919, %v1072_v22   ;;  %737 = vperm.xlu0 %918, %v1091_v25   ;;  %v570_v22 = vsub.s32 2, %v1236_v60 }
  0xf2   :  { %v1354_v18 = vpop.permute.xlu1 %349  ;;  %v1356_v21 = vpop.permute.xlu0 %353 }
  0xf3   :  { %1854 = vst [vmem:[#allocation16_spill] sm:$0xff] %v1356_v21 }
  0xf5   :  { %725 = vperm.xlu1 %919, %v1084_v24   ;;  %745 = vperm.xlu0 %918, %v1103_v27   ;;  %v377_v27 = vmul.f32 %v1359_v14, %v1275_v51 }
  0xf6   :  { %v358_v20 = vpop.permute.xlu1 %357  ;;  %v1363_v23 = vpop.permute.xlu0 %361 }
  0xf7   :  { %1855 = vst [vmem:[#allocation17_spill] sm:$0xff] %v1363_v23  ;;  %v404_v16 = vmul.f32 %v1359_v14, %v358_v20  ;;  %v1378_v23 = vrot.slane %v1250_v0, %v570_v22  ;;  %v380_v22 = vmul.f32 %v1359_v14, %v1287_v53 }
  0xf9   :  { %v1368_v25 = vadd.f32 %v404_v16, %v1264_v55  ;;  %733 = vperm.xlu1 %919, %v1096_v26   ;;  %753 = vperm.xlu0 %918, %v1115_v29   ;;  %v213_v26 = vmul.f32 %v1257_v57, %v1174_v37  ;;  %v378_v29 = vmul.f32 %v1359_v14, %v1281_v49 }
  0xfa   :  { %v366_v19 = vpop.permute.xlu1 %365  ;;  %v1372_v21 = vpop.permute.xlu0 %369 }
  0xfb   :  { %1856 = vst [vmem:[#allocation18_spill] sm:$0xff] %v1372_v21  ;;  %v406_v24 = vmul.f32 %v1359_v14, %v366_v19  ;;  %v409_v51 = vadd.f32 %v377_v27, %v213_v26  ;;  %v382_v27 = vmul.f32 %v1359_v14, %v1293_v45  ;;  %v384_v45 = vmul.f32 %v1359_v14, %v1299_v43 }
  0xfd   :  { %v1381_v20 = vadd.f32 %v406_v24, %v1271_v63  ;;  %741 = vperm.xlu1 %919, %v1108_v28   ;;  %761 = vperm.xlu0 %918, %v1127_v31   ;;  %v214_v28 = vmul.f32 %v1257_v57, %v1166_v34  ;;  %v216_v31 = vmul.f32 %v1257_v57, %v1180_v40 }
  0xff   :  { %v1389_v55 = vpop.permute.xlu1 %441  ;;  %v446_v16 = vpop.permute.xlu0 %445  ;;  %v410_v49 = vadd.f32 %v378_v29, %v214_v28  ;;  %v412_v21 = vadd.f32 %v380_v22, %v216_v31 }
 0x100   :  { %v573_v63 = vmul.f32 %v1378_v23, %v446_v16 }
 0x101   :  { %749 = vperm.xlu1 %919, %v1120_v30   ;;  %v218_v30 = vmul.f32 %v1257_v57, %v1186_v42 }
 0x102   :  { %v1399_v37 = vadd.f32 %v573_v63, %v409_v51  ;;  %v220_v63 = vmul.f32 %v1257_v57, %v1192_v44 }
 0x103   :  { %v450_v19 = vpop.permute.xlu1 %449  ;;  %v458_v24 = vpop.permute.xlu0 %457  ;;  %v414_v51 = vadd.f32 %v382_v27, %v218_v30  ;;  %v224_v30 = vmul.f32 %v1257_v57, %v1204_v48 }
 0x104   :  { %v574_v53 = vmul.f32 %v1378_v23, %v450_v19  ;;  %v576_v26 = vmul.f32 %v1378_v23, %v458_v24  ;;  %v416_v31 = vadd.f32 %v384_v45, %v220_v63  ;;  %v222_v19 = vmul.f32 %v1257_v57, %v1198_v46 }
 0x105   :  { %757 = vperm.xlu1 %919, %v1132_v32   ;;  %v390_v45 = vmul.f32 %v1359_v14, %v1317_v7  ;;  %v226_v63 = vmul.f32 %v1257_v57, %v1210_v50 }
 0x106   :  { %v1408_v34 = vadd.f32 %v574_v53, %v410_v49  ;;  %v1410_v40 = vadd.f32 %v576_v26, %v412_v21  ;;  %v386_v21 = vmul.f32 %v1359_v14, %v1305_v58  ;;  %v388_v53 = vmul.f32 %v1359_v14, %v1311_v5 }
 0x107   :  { %v1412_v29 = vpop.permute.xlu1 %453  ;;  %v466_v16 = vpop.permute.xlu0 %465  ;;  %v422_v48 = vadd.f32 %v390_v45, %v226_v63  ;;  %v396_v45 = vmul.f32 %v1359_v14, %v1335_v13  ;;  %v232_v63 = vmul.f32 %v1257_v57, %v1228_v56 }
 0x108   :  { %v578_v22 = vmul.f32 %v1378_v23, %v466_v16  ;;  %v418_v44 = vadd.f32 %v386_v21, %v222_v19  ;;  %v420_v46 = vadd.f32 %v388_v53, %v224_v30  ;;  %v392_v21 = vmul.f32 %v1359_v14, %v1323_v9 }
 0x109   :  { %v228_v19 = vmul.f32 %v1257_v57, %v1216_v52  ;;  %v394_v53 = vmul.f32 %v1359_v14, %v1329_v11  ;;  %v230_v30 = vmul.f32 %v1257_v57, %v1222_v54  ;;  %v428_v54 = vadd.f32 %v396_v45, %v232_v63 }
 0x10a   :  { %v1419_v32 = vadd.f32 %v578_v22, %v414_v51  ;;  %v402_v45 = vmul.f32 %v1359_v14, %v1354_v18  ;;  %v238_v63 = vmul.f32 %v1257_v57, %v1254_v38  ;;  %v376_v38 = vmul.f32 %v1359_v14, %v1277_v61 }
 0x10b   :  { %v1421_v28 = vpop.permute.xlu1 %461  ;;  %v474_v42 = vpop.permute.xlu0 %473  ;;  %v424_v50 = vadd.f32 %v392_v21, %v228_v19  ;;  %v426_v52 = vadd.f32 %v394_v53, %v230_v30  ;;  %v398_v21 = vmul.f32 %v1359_v14, %v1341_v15  ;;  %v234_v19 = vmul.f32 %v1257_v57, %v1234_v59 }
 0x10c   :  { %v580_v49 = vmul.f32 %v1378_v23, %v474_v42  ;;  %v400_v53 = vmul.f32 %v1359_v14, %v1347_v17  ;;  %v236_v30 = vmul.f32 %v1257_v57, %v1242_v62  ;;  %v434_v62 = vadd.f32 %v402_v45, %v238_v63 }
 0x10d   :  { %v430_v56 = vadd.f32 %v398_v21, %v234_v19  ;;  %v572_v45 = vmul.f32 %v1378_v23, %v1389_v55  ;;  %v379_v61 = vmul.f32 %v1359_v14, %v1283_v33  ;;  %v575_v55 = vmul.f32 %v1378_v23, %v1412_v29 }
 0x10e   :  { %v1428_v43 = vadd.f32 %v580_v49, %v416_v31  ;;  %v432_v59 = vadd.f32 %v400_v53, %v236_v30  ;;  %v381_v33 = vmul.f32 %v1359_v14, %v1289_v47 }
 0x10f   :  { %v1430_v24 = vpop.permute.xlu1 %469  ;;  %v482_v27 = vpop.permute.xlu0 %481 }
 0x110   :  { %v582_v26 = vmul.f32 %v1378_v23, %v482_v27 }
 0x112   :  { %v1437_v58 = vadd.f32 %v582_v26, %v418_v44 }
 0x113   :  { %v1439_v16 = vpop.permute.xlu1 %477  ;;  %v490_v51 = vpop.permute.xlu0 %489 }
 0x114   :  { %v584_v22 = vmul.f32 %v1378_v23, %v490_v51 }
 0x116   :  { %v1446_v5 = vadd.f32 %v584_v22, %v420_v46 }
 0x117   :  { %v1448_v42 = vpop.permute.xlu1 %485  ;;  %v498_v31 = vpop.permute.xlu0 %497 }
 0x118   :  { %v586_v49 = vmul.f32 %v1378_v23, %v498_v31 }
 0x11a   :  { %v1455_v7 = vadd.f32 %v586_v49, %v422_v48 }
 0x11b   :  { %v1457_v27 = vpop.permute.xlu1 %493  ;;  %v506_v44 = vpop.permute.xlu0 %505 }
 0x11c   :  { %v588_v26 = vmul.f32 %v1378_v23, %v506_v44 }
 0x11e   :  { %v1464_v9 = vadd.f32 %v588_v26, %v424_v50 }
 0x11f   :  { %v1466_v51 = vpop.permute.xlu1 %501  ;;  %v514_v46 = vpop.permute.xlu0 %513 }
 0x120   :  { %v590_v22 = vmul.f32 %v1378_v23, %v514_v46 }
 0x122   :  { %v1473_v11 = vadd.f32 %v590_v22, %v426_v52 }
 0x123   :  { %v1475_v31 = vpop.permute.xlu1 %509  ;;  %v522_v48 = vpop.permute.xlu0 %521 }
 0x124   :  { %v592_v49 = vmul.f32 %v1378_v23, %v522_v48 }
 0x126   :  { %v1482_v13 = vadd.f32 %v592_v49, %v428_v54 }
 0x127   :  { %v1484_v44 = vpop.permute.xlu1 %517  ;;  %v530_v50 = vpop.permute.xlu0 %529 }
 0x128   :  { %v594_v26 = vmul.f32 %v1378_v23, %v530_v50 }
 0x12a   :  { %v1491_v15 = vadd.f32 %v594_v26, %v430_v56  ;;  %v766_v56 = vsub.s32 3, %v1236_v60 }
 0x12b   :  { %v1493_v46 = vpop.permute.xlu1 %525  ;;  %v538_v52 = vpop.permute.xlu0 %537 }
 0x12c   :  { %v596_v22 = vmul.f32 %v1378_v23, %v538_v52 }
 0x12e   :  { %v1500_v17 = vadd.f32 %v596_v22, %v432_v59  ;;  %v212_v59 = vmul.f32 %v1257_v57, %v1168_v35  ;;  %v1524_v22 = vrot.slane %v1250_v0, %v766_v56 }
 0x12f   :  { %v1502_v48 = vpop.permute.xlu1 %533  ;;  %v546_v54 = vpop.permute.xlu0 %545 }
 0x130   :  { %v598_v21 = vmul.f32 %v1378_v23, %v546_v54 }
 0x132   :  { %v1505_v49 = vadd.f32 %v598_v21, %v434_v62  ;;  %v215_v62 = vmul.f32 %v1257_v57, %v1172_v36  ;;  %v217_v36 = vmul.f32 %v1257_v57, %v1178_v39 }
 0x133   :  { %v1507_v19 = vpop.permute.xlu1 %541  ;;  %v554_v50 = vpop.permute.xlu0 %553 }
 0x134   :  { %v600_v18 = vmul.f32 %v1378_v23, %v554_v50  ;;  %v411_v21 = vadd.f32 %v379_v61, %v215_v62  ;;  %v413_v47 = vadd.f32 %v381_v33, %v217_v36  ;;  %v581_v36 = vmul.f32 %v1378_v23, %v1439_v16 }
 0x136   :  { %v1512_v53 = vadd.f32 %v600_v18, %v1368_v25  ;;  %v408_v25 = vadd.f32 %v376_v38, %v212_v59  ;;  %v607_v29 = vadd.f32 %v575_v55, %v411_v21  ;;  %v577_v38 = vmul.f32 %v1378_v23, %v1421_v28  ;;  %v1857_v21 = vld [vmem:[#allocation2_spill] sm:$0xff] }
 0x137   :  { %v1516_v26 = vpop.permute.xlu1 %549  ;;  %v562_v30 = vpop.permute.xlu0 %561  ;;  %v383_v59 = vmul.f32 %v1359_v14, %v1295_v2  ;;  %v579_v28 = vmul.f32 %v1378_v23, %v1430_v24  ;;  %v221_v33 = vmul.f32 %v1257_v57, %v1857_v21 }
 0x138   :  { %v602_v52 = vmul.f32 %v1378_v23, %v562_v30  ;;  %v604_v35 = vadd.f32 %v572_v45, %v408_v25  ;;  %v219_v45 = vmul.f32 %v1257_v57, %v1184_v41 }
 0x13a   :  { %v1527_v60 = vadd.f32 %v602_v52, %v1381_v20  ;;  %v1541_v20 = vld [vmem:[%s1838_s2] ss:$0 sm:$0xff]  ;;  %v415_v55 = vadd.f32 %v383_v59, %v219_v45 }
 0x13b   :  { %v1531_v63 = vpop.permute.xlu1 %557 }
 0x13c   :  { %v638_v54 = vpop.permute.xlu0 %637 }
 0x13d   :  { %v768_v0 = vmul.f32 %v1524_v22, %v638_v54  ;;  %v609_v54 = vadd.f32 %v577_v38, %v413_v47 }
 0x13f   :  { %v800_v50 = vadd.f32 %v768_v0, %v604_v35  ;;  %v1545_v18 = vpop.permute.xlu1 %565  ;;  %v385_v0 = vmul.f32 %v1359_v14, %v1301_v3 }
 0x140   :  { %v650_v56 = vpop.permute.xlu0 %649 }
 0x141   :  { %v838_v30 = vadd.f32 %v1541_v20, %v800_v50  ;;  %v771_v52 = vmul.f32 %v1524_v22, %v650_v56  ;;  %v611_v50 = vadd.f32 %v579_v28, %v415_v55  ;;  %v417_v59 = vadd.f32 %v385_v0, %v221_v33 }
 0x143   :  { %871 = vst.msk [vmem:[%s1839_s3] sm:$0xff] %vm870_vm0, %v838_v30  ;;  %v803_v39 = vadd.f32 %v771_v52, %v607_v29  ;;  %v613_v28 = vadd.f32 %v581_v36, %v417_v59 }
 0x144   :  { %v642_v25 = vpop.permute.xlu1 %641  ;;  %v658_v61 = vpop.permute.xlu0 %657 }
 0x145   :  { %v841_v62 = vadd.f32 %v1541_v20, %v803_v39  ;;  %v769_v2 = vmul.f32 %v1524_v22, %v642_v25  ;;  %v773_v35 = vmul.f32 %v1524_v22, %v658_v61  ;;  %v1858_v39 = vld [vmem:[#allocation3_spill] sm:$0xff] }
 0x146   :  { %v223_v45 = vmul.f32 %v1257_v57, %v1858_v39 }
 0x147   :  { %874 = vst.msk [vmem:[%s1839_s3 + $0x18] sm:$0xff] %vm870_vm0, %v841_v62  ;;  %v801_v41 = vadd.f32 %v769_v2, %v1399_v37  ;;  %v805_v24 = vadd.f32 %v773_v35, %v609_v54  ;;  %v387_v37 = vmul.f32 %v1359_v14, %v1307_v4  ;;  %v583_v4 = vmul.f32 %v1378_v23, %v1448_v42 }
 0x148   :  { %v646_v56 = vpop.permute.xlu1 %645  ;;  %v666_v29 = vpop.permute.xlu0 %665 }
 0x149   :  { %v839_v38 = vadd.f32 %v1541_v20, %v801_v41  ;;  %v843_v3 = vadd.f32 %v1541_v20, %v805_v24  ;;  %v770_v30 = vmul.f32 %v1524_v22, %v646_v56  ;;  %v775_v52 = vmul.f32 %v1524_v22, %v666_v29  ;;  %v1859_v41 = vld [vmem:[#allocation4_spill] sm:$0xff] }
 0x14a   :  { %v419_v55 = vadd.f32 %v387_v37, %v223_v45  ;;  %v225_v24 = vmul.f32 %v1257_v57, %v1859_v41 }
 0x14b   :  { %872 = vst.msk [vmem:[%s1839_s3 + $0x8] sm:$0xff] %vm870_vm0, %v839_v38  ;;  %876 = vst.msk [vmem:[%s1839_s3 + $0x28] sm:$0xff] %vm870_vm0, %v843_v3  ;;  %v802_v16 = vadd.f32 %v770_v30, %v1408_v34  ;;  %v807_v47 = vadd.f32 %v775_v52, %v611_v50  ;;  %v389_v34 = vmul.f32 %v1359_v14, %v1313_v1  ;;  %v1860_v52 = vld [vmem:[#allocation5_spill] sm:$0xff] }
 0x14c   :  { %v654_v25 = vpop.permute.xlu1 %653  ;;  %v674_v61 = vpop.permute.xlu0 %673  ;;  %v615_v21 = vadd.f32 %v583_v4, %v419_v55  ;;  %v585_v1 = vmul.f32 %v1378_v23, %v1457_v27  ;;  %v227_v59 = vmul.f32 %v1257_v57, %v1860_v52  ;;  %v1863_v52 = vld [vmem:[#allocation8_spill] sm:$0xff] }
 0x14d   :  { %v840_v54 = vadd.f32 %v1541_v20, %v802_v16  ;;  %v845_v62 = vadd.f32 %v1541_v20, %v807_v47  ;;  %v772_v2 = vmul.f32 %v1524_v22, %v654_v25  ;;  %v777_v35 = vmul.f32 %v1524_v22, %v674_v61 }
 0x14e   :  { %v421_v3 = vadd.f32 %v389_v34, %v225_v24 }
 0x14f   :  { %873 = vst.msk [vmem:[%s1839_s3 + $0x10] sm:$0xff] %vm870_vm0, %v840_v54  ;;  %878 = vst.msk [vmem:[%s1839_s3 + $0x38] sm:$0xff] %vm870_vm0, %v845_v62  ;;  %v804_v42 = vadd.f32 %v772_v2, %v1410_v40  ;;  %v809_v0 = vadd.f32 %v777_v35, %v613_v28  ;;  %v391_v40 = vmul.f32 %v1359_v14, %v1319_v6  ;;  %v1861_v54 = vld [vmem:[#allocation6_spill] sm:$0xff] }
 0x150   :  { %v662_v33 = vpop.permute.xlu1 %661  ;;  %v682_v50 = vpop.permute.xlu0 %681  ;;  %v617_v37 = vadd.f32 %v585_v1, %v421_v3  ;;  %v587_v6 = vmul.f32 %v1378_v23, %v1466_v51  ;;  %v229_v62 = vmul.f32 %v1257_v57, %v1861_v54  ;;  %v1862_v1 = vld [vmem:[#allocation7_spill] sm:$0xff] }
 0x151   :  { %v842_v36 = vadd.f32 %v1541_v20, %v804_v42  ;;  %v847_v56 = vadd.f32 %v1541_v20, %v809_v0  ;;  %v774_v29 = vmul.f32 %v1524_v22, %v662_v33  ;;  %v779_v38 = vmul.f32 %v1524_v22, %v682_v50 }
 0x152   :  { %v423_v25 = vadd.f32 %v391_v40, %v227_v59  ;;  %v231_v33 = vmul.f32 %v1257_v57, %v1862_v1  ;;  %v233_v59 = vmul.f32 %v1257_v57, %v1863_v52  ;;  %v597_v1 = vmul.f32 %v1378_v23, %v1507_v19 }
 0x153   :  { %875 = vst.msk [vmem:[%s1839_s3 + $0x20] sm:$0xff] %vm870_vm0, %v842_v36  ;;  %880 = vst.msk [vmem:[%s1839_s3 + $0x48] sm:$0xff] %vm870_vm0, %v847_v56  ;;  %v806_v27 = vadd.f32 %v774_v29, %v1419_v32  ;;  %v811_v30 = vadd.f32 %v779_v38, %v615_v21  ;;  %v393_v32 = vmul.f32 %v1359_v14, %v1325_v8 }
 0x154   :  { %v670_v16 = vpop.permute.xlu1 %669  ;;  %v690_v47 = vpop.permute.xlu0 %689  ;;  %v619_v2 = vadd.f32 %v587_v6, %v423_v25  ;;  %v589_v8 = vmul.f32 %v1378_v23, %v1475_v31 }
 0x155   :  { %v844_v39 = vadd.f32 %v1541_v20, %v806_v27  ;;  %v849_v45 = vadd.f32 %v1541_v20, %v811_v30  ;;  %v776_v28 = vmul.f32 %v1524_v22, %v670_v16  ;;  %v781_v4 = vmul.f32 %v1524_v22, %v690_v47 }
 0x156   :  { %v425_v24 = vadd.f32 %v393_v32, %v229_v62  ;;  %v595_v62 = vmul.f32 %v1378_v23, %v1502_v48 }
 0x157   :  { %877 = vst.msk [vmem:[%s1839_s3 + $0x30] sm:$0xff] %vm870_vm0, %v844_v39  ;;  %882 = vst.msk [vmem:[%s1839_s3 + $0x58] sm:$0xff] %vm870_vm0, %v849_v45  ;;  %v808_v51 = vadd.f32 %v776_v28, %v1428_v43  ;;  %v813_v61 = vadd.f32 %v781_v4, %v617_v37  ;;  %v395_v43 = vmul.f32 %v1359_v14, %v1331_v10 }
 0x158   :  { %v678_v35 = vpop.permute.xlu1 %677  ;;  %v698_v55 = vpop.permute.xlu0 %697  ;;  %v621_v50 = vadd.f32 %v589_v8, %v425_v24  ;;  %v591_v10 = vmul.f32 %v1378_v23, %v1484_v44 }
 0x159   :  { %v846_v34 = vadd.f32 %v1541_v20, %v808_v51  ;;  %v851_v42 = vadd.f32 %v1541_v20, %v813_v61  ;;  %v778_v0 = vmul.f32 %v1524_v22, %v678_v35  ;;  %v783_v41 = vmul.f32 %v1524_v22, %v698_v55  ;;  %v1865_v51 = vld [vmem:[#allocation9_spill] sm:$0xff] }
 0x15a   :  { %v427_v27 = vadd.f32 %v395_v43, %v231_v33  ;;  %v235_v61 = vmul.f32 %v1257_v57, %v1865_v51  ;;  %v1867_v43 = vld [vmem:[#allocation10_spill] sm:$0xff] }
 0x15b   :  { %879 = vst.msk [vmem:[%s1839_s3 + $0x40] sm:$0xff] %vm870_vm0, %v846_v34  ;;  %884 = vst.msk [vmem:[%s1839_s3 + $0x68] sm:$0xff] %vm870_vm0, %v851_v42  ;;  %v810_v31 = vadd.f32 %v778_v0, %v1437_v58  ;;  %v815_v21 = vadd.f32 %v783_v41, %v619_v2  ;;  %v397_v58 = vmul.f32 %v1359_v14, %v1337_v12 }
 0x15c   :  { %v686_v36 = vpop.permute.xlu1 %685  ;;  %v706_v56 = vpop.permute.xlu0 %705  ;;  %v623_v37 = vadd.f32 %v591_v10, %v427_v27  ;;  %v593_v12 = vmul.f32 %v1378_v23, %v1493_v46  ;;  %v1869_v27 = vld [vmem:[#allocation11_spill] sm:$0xff] }
 0x15d   :  { %v848_v29 = vadd.f32 %v1541_v20, %v810_v31  ;;  %v853_v38 = vadd.f32 %v1541_v20, %v815_v21  ;;  %v780_v3 = vmul.f32 %v1524_v22, %v686_v36  ;;  %v785_v40 = vmul.f32 %v1524_v22, %v706_v56 }
 0x15e   :  { %v429_v4 = vadd.f32 %v397_v58, %v233_v59  ;;  %v237_v31 = vmul.f32 %v1257_v57, %v1867_v43  ;;  %v239_v58 = vmul.f32 %v1257_v57, %v1869_v27 }
 0x15f   :  { %881 = vst.msk [vmem:[%s1839_s3 + $0x50] sm:$0xff] %vm870_vm0, %v848_v29  ;;  %886 = vst.msk [vmem:[%s1839_s3 + $0x78] sm:$0xff] %vm870_vm0, %v853_v38  ;;  %v812_v44 = vadd.f32 %v780_v3, %v1446_v5  ;;  %v817_v30 = vadd.f32 %v785_v40, %v621_v50  ;;  %v1864_v5 = vld [vmem:[#allocation14_spill] sm:$0xff] }
 0x160   :  { %v694_v6 = vpop.permute.xlu1 %693  ;;  %v714_v16 = vpop.permute.xlu0 %713  ;;  %v399_v25 = vmul.f32 %v1359_v14, %v1864_v5  ;;  %v625_v54 = vadd.f32 %v593_v12, %v429_v4 }
 0x161   :  { %v850_v47 = vadd.f32 %v1541_v20, %v812_v44  ;;  %v855_v39 = vadd.f32 %v1541_v20, %v817_v30  ;;  %v782_v45 = vmul.f32 %v1524_v22, %v694_v6  ;;  %v787_v28 = vmul.f32 %v1524_v22, %v714_v16 }
 0x162   :  { %v431_v0 = vadd.f32 %v399_v25, %v235_v61  ;;  %v599_v30 = vmul.f32 %v1378_v23, %v1516_v26  ;;  %v601_v25 = vmul.f32 %v1378_v23, %v1531_v63 }
 0x163   :  { %883 = vst.msk [vmem:[%s1839_s3 + $0x60] sm:$0xff] %vm870_vm0, %v850_v47  ;;  %888 = vst.msk [vmem:[%s1839_s3 + $0x88] sm:$0xff] %vm870_vm0, %v855_v39  ;;  %v814_v46 = vadd.f32 %v782_v45, %v1455_v7  ;;  %v819_v32 = vadd.f32 %v787_v28, %v623_v37  ;;  %v1866_v7 = vld [vmem:[#allocation15_spill] sm:$0xff]  ;;  %v1871_v28 = vld [vmem:[#allocation12_spill] sm:$0xff] }
 0x164   :  { %v702_v2 = vpop.permute.xlu1 %701  ;;  %v722_v8 = vpop.permute.xlu0 %721  ;;  %v401_v41 = vmul.f32 %v1359_v14, %v1866_v7  ;;  %v627_v21 = vadd.f32 %v595_v62, %v431_v0  ;;  %v241_v4 = vmul.f32 %v1257_v57, %v1871_v28 }
 0x165   :  { %v852_v35 = vadd.f32 %v1541_v20, %v814_v46  ;;  %v857_v55 = vadd.f32 %v1541_v20, %v819_v32  ;;  %v784_v34 = vmul.f32 %v1524_v22, %v702_v2  ;;  %v789_v42 = vmul.f32 %v1524_v22, %v722_v8 }
 0x166   :  { %v433_v38 = vadd.f32 %v401_v41, %v237_v31 }
 0x167   :  { %885 = vst.msk [vmem:[%s1839_s3 + $0x70] sm:$0xff] %vm870_vm0, %v852_v35  ;;  %890 = vst.msk [vmem:[%s1839_s3 + $0x98] sm:$0xff] %vm870_vm0, %v857_v55  ;;  %v816_v48 = vadd.f32 %v784_v34, %v1464_v9  ;;  %v821_v24 = vadd.f32 %v789_v42, %v625_v54  ;;  %v1868_v9 = vld [vmem:[#allocation16_spill] sm:$0xff]  ;;  %v1873_v55 = vld [vmem:[#allocation13_spill] sm:$0xff] }
 0x168   :  { %v710_v33 = vpop.permute.xlu1 %709  ;;  %v730_v50 = vpop.permute.xlu0 %729  ;;  %v403_v3 = vmul.f32 %v1359_v14, %v1868_v9  ;;  %v629_v44 = vadd.f32 %v597_v1, %v433_v38  ;;  %v243_v34 = vmul.f32 %v1257_v57, %v1873_v55 }
 0x169   :  { %v854_v10 = vadd.f32 %v1541_v20, %v816_v48  ;;  %v859_v36 = vadd.f32 %v1541_v20, %v821_v24  ;;  %v786_v56 = vmul.f32 %v1524_v22, %v710_v33  ;;  %v791_v29 = vmul.f32 %v1524_v22, %v730_v50 }
 0x16a   :  { %v435_v47 = vadd.f32 %v403_v3, %v239_v58 }
 0x16b   :  { %887 = vst.msk [vmem:[%s1839_s3 + $0x80] sm:$0xff] %vm870_vm0, %v854_v10  ;;  %892 = vst.msk [vmem:[%s1839_s3 + $0xa8] sm:$0xff] %vm870_vm0, %v859_v36  ;;  %v818_v19 = vadd.f32 %v786_v56, %v1473_v11  ;;  %v823_v40 = vadd.f32 %v791_v29, %v627_v21  ;;  %v1870_v11 = vld [vmem:[#allocation17_spill] sm:$0xff] }
 0x16c   :  { %v718_v52 = vpop.permute.xlu1 %717  ;;  %v738_v59 = vpop.permute.xlu0 %737  ;;  %v405_v39 = vmul.f32 %v1359_v14, %v1870_v11  ;;  %v631_v5 = vadd.f32 %v599_v30, %v435_v47 }
 0x16d   :  { %v856_v37 = vadd.f32 %v1541_v20, %v818_v19  ;;  %v861_v12 = vadd.f32 %v1541_v20, %v823_v40  ;;  %v788_v6 = vmul.f32 %v1524_v22, %v718_v52  ;;  %v793_v16 = vmul.f32 %v1524_v22, %v738_v59 }
 0x16e   :  { %v437_v2 = vadd.f32 %v405_v39, %v241_v4 }
 0x16f   :  { %889 = vst.msk [vmem:[%s1839_s3 + $0x90] sm:$0xff] %vm870_vm0, %v856_v37  ;;  %894 = vst.msk [vmem:[%s1839_s3 + $0xb8] sm:$0xff] %vm870_vm0, %v861_v12  ;;  %v820_v26 = vadd.f32 %v788_v6, %v1482_v13  ;;  %v825_v45 = vadd.f32 %v793_v16, %v629_v44  ;;  %v1872_v13 = vld [vmem:[#allocation18_spill] sm:$0xff] }
 0x170   :  { %v726_v46 = vpop.permute.xlu1 %725  ;;  %v746_v32 = vpop.permute.xlu0 %745  ;;  %v407_v8 = vmul.f32 %v1359_v14, %v1872_v13  ;;  %v633_v42 = vadd.f32 %v601_v25, %v437_v2  ;;  %v603_v14 = vmul.f32 %v1378_v23, %v1545_v18 }
 0x171   :  { %v858_v51 = vadd.f32 %v1541_v20, %v820_v26  ;;  %v863_v61 = vadd.f32 %v1541_v20, %v825_v45  ;;  %v790_v54 = vmul.f32 %v1524_v22, %v726_v46  ;;  %v795_v62 = vmul.f32 %v1524_v22, %v746_v32 }
 0x172   :  { %v439_v31 = vadd.f32 %v407_v8, %v243_v34 }
 0x173   :  { %891 = vst.msk [vmem:[%s1839_s3 + $0xa0] sm:$0xff] %vm870_vm0, %v858_v51  ;;  %896 = vst.msk [vmem:[%s1839_s3 + $0xc8] sm:$0xff] %vm870_vm0, %v863_v61  ;;  %v822_v63 = vadd.f32 %v790_v54, %v1491_v15  ;;  %v827_v35 = vadd.f32 %v795_v62, %v631_v5 }
 0x174   :  { %v734_v0 = vpop.permute.xlu1 %733  ;;  %v754_v7 = vpop.permute.xlu0 %753  ;;  %v635_v15 = vadd.f32 %v603_v14, %v439_v31 }
 0x175   :  { %v860_v41 = vadd.f32 %v1541_v20, %v822_v63  ;;  %v865_v48 = vadd.f32 %v1541_v20, %v827_v35  ;;  %v792_v24 = vmul.f32 %v1524_v22, %v734_v0  ;;  %v797_v43 = vmul.f32 %v1524_v22, %v754_v7 }
 0x177   :  { %893 = vst.msk [vmem:[%s1839_s3 + $0xb0] sm:$0xff] %vm870_vm0, %v860_v41  ;;  %898 = vst.msk [vmem:[%s1839_s3 + $0xd8] sm:$0xff] %vm870_vm0, %v865_v48  ;;  %v824_v57 = vadd.f32 %v792_v24, %v1500_v17  ;;  %v829_v23 = vadd.f32 %v797_v43, %v633_v42 }
 0x178   :  { %v742_v18 = vpop.permute.xlu1 %741  ;;  %v762_v21 = vpop.permute.xlu0 %761 }
 0x179   :  { %v862_v1 = vadd.f32 %v1541_v20, %v824_v57  ;;  %v867_v33 = vadd.f32 %v1541_v20, %v829_v23  ;;  %v794_v50 = vmul.f32 %v1524_v22, %v742_v18  ;;  %v799_v10 = vmul.f32 %v1524_v22, %v762_v21 }
 0x17b   :  { %895 = vst.msk [vmem:[%s1839_s3 + $0xc0] sm:$0xff] %vm870_vm0, %v862_v1  ;;  %900 = vst.msk [vmem:[%s1839_s3 + $0xe8] sm:$0xff] %vm870_vm0, %v867_v33  ;;  %v826_v17 = vadd.f32 %v794_v50, %v1505_v49  ;;  %v831_v36 = vadd.f32 %v799_v10, %v635_v15 }
 0x17c   :  { %v750_v56 = vpop.permute.xlu1 %749 }
 0x17d   :  { %v864_v29 = vadd.f32 %v1541_v20, %v826_v17  ;;  %v869_v38 = vadd.f32 %v1541_v20, %v831_v36  ;;  %v796_v9 = vmul.f32 %v1524_v22, %v750_v56 }
 0x17f   :  { %897 = vst.msk [vmem:[%s1839_s3 + $0xd0] sm:$0xff] %vm870_vm0, %v864_v29  ;;  %902 = vst.msk [vmem:[%s1839_s3 + $0xf8] sm:$0xff] %vm870_vm0, %v869_v38  ;;  %v828_v49 = vadd.f32 %v796_v9, %v1512_v53 }
 0x180   :  { %v758_v3 = vpop.permute.xlu1 %757 }
 0x181   :  { %v866_v19 = vadd.f32 %v1541_v20, %v828_v49  ;;  %v798_v40 = vmul.f32 %v1524_v22, %v758_v3 }
 0x183   :  { %899 = vst.msk [vmem:[%s1839_s3 + $0xe0] sm:$0xff] %vm870_vm0, %v866_v19  ;;  %v830_v27 = vadd.f32 %v798_v40, %v1527_v60 }
 0x185   :  { %v868_v58 = vadd.f32 %v1541_v20, %v830_v27 }
 0x187   :  { %901 = vst.msk [vmem:[%s1839_s3 + $0xf0] sm:$0xff] %vm870_vm0, %v868_v58 }

</bundles_post_ra>
